<compile_context>
chip_gen: v7x
topology: tpu7x:2x2x1
jax: 0.10.0
libtpu: 0.0.40
codegen_flags: <defaults>
</compile_context>

<pallas_src>
import jax
import jax.numpy as jnp
from jax.experimental import pallas as pl
from jax.experimental.pallas import tpu as pltpu


def perceptron_kernel(x_ref, w1_ref, b1_ref, w2_ref, b2_ref, o_ref):
    # x_ref : (TILE_B, IN)   w1_ref: (H, IN)   b1_ref: (H, 1)
    # w2_ref: (1, H)         b2_ref: (1, 1)    o_ref : (1, TILE_B)
    #
    # First linear, transposed so batch lands on the lane axis:
    #   h^T[h, b] = sum_k W1[h, k] * x[b, k]      (A @ B^T form, MXU-native)
    ht = jax.lax.dot_general(
        w1_ref[...], x_ref[...],
        dimension_numbers=(((1,), (1,)), ((), ())),
        preferred_element_type=jnp.float32,
    )                                               # (H, TILE_B), f32
    ht = jnp.maximum(ht + b1_ref[...], 0.0)         # bias + ReLU on the VPU

    # Second linear (64 -> 1) on the MXU in the same transposed orientation:
    #   y^T[0, b] = sum_h w2[0, h] * relu_h^T[h, b]
    # Output stays (1, TILE_B) lane-dense -> unmasked full-lane stores.
    yt = jax.lax.dot_general(
        w2_ref[...], ht,
        dimension_numbers=(((1,), (0,)), ((), ())),
        preferred_element_type=jnp.float32,
    )                                               # (1, TILE_B)
    o_ref[...] = (yt + b2_ref[...]).astype(o_ref.dtype)
    # TODO(synk): Dropout(0.1) is identity here (eval-mode semantics).


def _pick_tile(batch, tile_max):
    """Pick (tile_b, num_tiles): tile_b <= tile_max, multiple of 128,
    >= 2 tiles when batch allows (megacore sharding), padding < num_tiles*128 rows."""
    if batch <= 128:
        return 128, 1
    num_tiles = max(2, pl.cdiv(batch, tile_max))
    tile_b = 128 * pl.cdiv(pl.cdiv(batch, num_tiles), 128)
    return tile_b, pl.cdiv(batch, tile_b)


def _estimate_vmem_bytes(tile_b, in_dim, hidden):
    """Rough per-call VMEM footprint (f32, lane-padded, double-buffered I/O)."""
    lane, sub = 128, 8
    pad = lambda n, m: ((n + m - 1) // m) * m
    x_blk = tile_b * pad(in_dim, lane) * 4          # (TILE_B, 32) pads to 128 lanes
    w1_blk = pad(hidden, sub) * pad(in_dim, lane) * 4
    b1_blk = pad(hidden, sub) * lane * 4
    w2_blk = sub * pad(hidden, lane) * 4
    b2_blk = sub * lane * 4
    out_blk = sub * tile_b * 4
    ht_tmp = pad(hidden, sub) * tile_b * 4 * 2      # (H, TILE_B) intermediate + slack
    return 2 * (x_blk + w1_blk + b1_blk + w2_blk + b2_blk + out_blk) + ht_tmp


def perceptron_forward(x, w1, b1, w2, b2, *, tile_b=8192):
    """x: (B, IN); w1: (H, IN); b1: (H,); w2: (1, H); b2: (1,). Returns (B, 1).

    tile_b is an upper bound on the batch tile; sweep larger values
    (16384-32768) on v7x -- vmem_limit_bytes is raised automatically if needed.
    """
    B, IN = x.shape
    H = w1.shape[0]

    tile_b, num_tiles = _pick_tile(B, max(128, tile_b))
    b_pad = num_tiles * tile_b
    if b_pad != B:
        x = jnp.pad(x, ((0, b_pad - B), (0, 0)))

    # Parameter plumbing: cheap reshapes only (w1 keeps its native (H, IN)
    # layout -> no per-call transpose op).
    b1_col = b1.reshape(H, 1)
    w2_row = w2.reshape(1, H)
    b2_2d = b2.reshape(1, 1)

    # Raise the scoped VMEM limit only when the footprint needs it (big tiles).
    est = _estimate_vmem_bytes(tile_b, IN, H)
    vmem_limit = None
    if est > 30 * 1024 * 1024:
        vmem_limit = min(est + (8 << 20), 48 << 20)   # stay under v7x's 64 MiB physical

    rep = lambda i: (0, 0)  # weights/biases: same block every step -> VMEM-resident
    out = pl.pallas_call(
        perceptron_kernel,
        out_shape=jax.ShapeDtypeStruct((1, b_pad), jnp.float32),
        grid=(num_tiles,),
        in_specs=[
            pl.BlockSpec((tile_b, IN), lambda i: (i, 0)),   # x: streamed batch tiles
            pl.BlockSpec((H, IN), rep),                     # w1 (native torch layout)
            pl.BlockSpec((H, 1), rep),                      # b1 (column)
            pl.BlockSpec((1, H), rep),                      # w2 (row, feeds MXU dot)
            pl.BlockSpec((1, 1), rep),                      # b2
        ],
        out_specs=pl.BlockSpec((1, tile_b), lambda i: (0, i)),  # lane-dense rows
        compiler_params=pltpu.CompilerParams(
            dimension_semantics=("parallel",),  # v7x: shard batch tiles over 2 TCs
            vmem_limit_bytes=vmem_limit,
        ),
    )(x, w1, b1_col, w2_row, b2_2d)

    return out[0, :B].reshape(B, 1)


def reference_forward(x, w1, b1, w2, b2):
    h = jnp.maximum(x @ w1.T + b1, 0.0)
    return h @ w2.T + b2


if __name__ == "__main__":
    batch = 8
    input_size = 32
    hidden_size = 64   # fixed by nn.Linear(64, 1) in the module

    key = jax.random.PRNGKey(0)
    kx, k1, k2, k3, k4 = jax.random.split(key, 5)

    x = jax.random.normal(kx, (batch, input_size), dtype=jnp.float32)
    # Deterministic "torch-like" uniform init for parameters.
    bound1 = 1.0 / (input_size ** 0.5)
    w1 = jax.random.uniform(k1, (hidden_size, input_size), jnp.float32, -bound1, bound1)
    b1 = jax.random.uniform(k2, (hidden_size,), jnp.float32, -bound1, bound1)
    bound2 = 1.0 / (hidden_size ** 0.5)
    w2 = jax.random.uniform(k3, (1, hidden_size), jnp.float32, -bound2, bound2)
    b2 = jax.random.uniform(k4, (1,), jnp.float32, -bound2, bound2)

    out = perceptron_forward(x, w1, b1, w2, b2)
    jax.block_until_ready(out)

    ref = reference_forward(x, w1, b1, w2, b2)
    assert out.shape == (batch, 1), out.shape
    assert jnp.allclose(out, ref, atol=1e-5, rtol=1e-5), float(jnp.max(jnp.abs(out - ref)))

    # Exercise the multi-tile (>=2 grid steps, padded last tile) path too.
    batch2 = 300
    x2 = jax.random.normal(kx, (batch2, input_size), dtype=jnp.float32)
    out2 = perceptron_forward(x2, w1, b1, w2, b2)
    jax.block_until_ready(out2)
    ref2 = reference_forward(x2, w1, b1, w2, b2)
    assert out2.shape == (batch2, 1), out2.shape
    assert jnp.allclose(out2, ref2, atol=1e-5, rtol=1e-5), float(jnp.max(jnp.abs(out2 - ref2)))

    print("KERNEL_OK")
</pallas_src>

<mosaic_0001>
module attributes {stable_mosaic.version = 11 : i64} {
  func.func @perceptron_kernel(%arg0: i32, %arg1: memref<128x32xf32, #tpu.memory_space<vmem>>, %arg2: memref<64x32xf32, #tpu.memory_space<vmem>>, %arg3: memref<64x1xf32, #tpu.memory_space<vmem>>, %arg4: memref<1x64xf32, #tpu.memory_space<vmem>>, %arg5: memref<1x1xf32, #tpu.memory_space<vmem>>, %arg6: memref<1x128xf32, #tpu.memory_space<vmem>>) attributes {dimension_semantics = [#tpu.dimension_semantics<parallel>], iteration_bounds = array<i64: 1>, scalar_prefetch = 0 : i64, scratch_operands = 0 : i64, tpu.core_type = #tpu.core_type<tc>, window_params = [{transform_indices = @transform_0, window_bounds = array<i64: 128, 32>}, {pipeline_mode = #tpu.pipeline_mode<synchronous>, transform_indices = @transform_1, window_bounds = array<i64: 64, 32>}, {pipeline_mode = #tpu.pipeline_mode<synchronous>, transform_indices = @transform_2, window_bounds = array<i64: 64, 1>}, {pipeline_mode = #tpu.pipeline_mode<synchronous>, transform_indices = @transform_3, window_bounds = array<i64: 1, 64>}, {pipeline_mode = #tpu.pipeline_mode<synchronous>, transform_indices = @transform_4, window_bounds = array<i64: 1, 1>}, {transform_indices = @transform_5, window_bounds = array<i64: 1, 128>}]} {
    %c0 = arith.constant 0 : index
    %c0_0 = arith.constant 0 : index
    %0 = vector.load %arg2[%c0, %c0_0] : memref<64x32xf32, #tpu.memory_space<vmem>>, vector<64x32xf32>
    %c0_1 = arith.constant 0 : index
    %c0_2 = arith.constant 0 : index
    %1 = vector.load %arg1[%c0_1, %c0_2] : memref<128x32xf32, #tpu.memory_space<vmem>>, vector<128x32xf32>
    %cst = arith.constant dense<0.000000e+00> : vector<64x128xf32>
    %2 = tpu.matmul %0, %1, %cst {dimension_numbers = #tpu.dot_dimension_numbers<[1], [1], [0], [0], [0, 0, 1, 0], [], []>} : vector<64x32xf32>, vector<128x32xf32>, vector<64x128xf32> -> vector<64x128xf32>
    %c0_3 = arith.constant 0 : index
    %c0_4 = arith.constant 0 : index
    %3 = vector.load %arg3[%c0_3, %c0_4] : memref<64x1xf32, #tpu.memory_space<vmem>>, vector<64x1xf32>
    %4 = vector.broadcast %3 : vector<64x1xf32> to vector<64x128xf32>
    %5 = arith.addf %2, %4 : vector<64x128xf32>
    %cst_5 = arith.constant 0.000000e+00 : f32
    %6 = vector.broadcast %cst_5 : f32 to vector<64x128xf32>
    %7 = arith.maximumf %5, %6 : vector<64x128xf32>
    %c0_6 = arith.constant 0 : index
    %c0_7 = arith.constant 0 : index
    %8 = vector.load %arg4[%c0_6, %c0_7] : memref<1x64xf32, #tpu.memory_space<vmem>>, vector<1x64xf32>
    %cst_8 = arith.constant dense<0.000000e+00> : vector<1x128xf32>
    %9 = tpu.matmul %8, %7, %cst_8 {dimension_numbers = #tpu.dot_dimension_numbers<[1], [0], [0], [1], [0, 0, 1, 1], [], []>} : vector<1x64xf32>, vector<64x128xf32>, vector<1x128xf32> -> vector<1x128xf32>
    %c0_9 = arith.constant 0 : index
    %c0_10 = arith.constant 0 : index
    %10 = vector.load %arg5[%c0_9, %c0_10] : memref<1x1xf32, #tpu.memory_space<vmem>>, vector<1x1xf32>
    %11 = vector.broadcast %10 : vector<1x1xf32> to vector<1x128xf32>
    %12 = arith.addf %9, %11 : vector<1x128xf32>
    %c0_11 = arith.constant 0 : index
    %c0_12 = arith.constant 0 : index
    %13 = vector.load %arg6[%c0_11, %c0_12] : memref<1x128xf32, #tpu.memory_space<vmem>>, vector<1x128xf32>
    tpu.vector_store %arg6[%c0_11, %c0_12], %12 {strides = array<i32>} : memref<1x128xf32, #tpu.memory_space<vmem>>, vector<1x128xf32>,
    return
  }
  func.func @transform_0(%arg0: i32) -> (i32, i32) {
    %c0_i32 = arith.constant 0 : i32
    %c0_i32_0 = arith.constant 0 : i32
    return %arg0, %c0_i32 : i32, i32
  }
  func.func @transform_1(%arg0: i32) -> (i32, i32) {
    %c0_i32 = arith.constant 0 : i32
    %c0_i32_0 = arith.constant 0 : i32
    %c0_i32_1 = arith.constant 0 : i32
    return %c0_i32, %c0_i32_0 : i32, i32
  }
  func.func @transform_2(%arg0: i32) -> (i32, i32) {
    %c0_i32 = arith.constant 0 : i32
    %c0_i32_0 = arith.constant 0 : i32
    %c0_i32_1 = arith.constant 0 : i32
    return %c0_i32, %c0_i32_0 : i32, i32
  }
  func.func @transform_3(%arg0: i32) -> (i32, i32) {
    %c0_i32 = arith.constant 0 : i32
    %c0_i32_0 = arith.constant 0 : i32
    %c0_i32_1 = arith.constant 0 : i32
    return %c0_i32, %c0_i32_0 : i32, i32
  }
  func.func @transform_4(%arg0: i32) -> (i32, i32) {
    %c0_i32 = arith.constant 0 : i32
    %c0_i32_0 = arith.constant 0 : i32
    %c0_i32_1 = arith.constant 0 : i32
    return %c0_i32, %c0_i32_0 : i32, i32
  }
  func.func @transform_5(%arg0: i32) -> (i32, i32) {
    %c0_i32 = arith.constant 0 : i32
    %c0_i32_0 = arith.constant 0 : i32
    return %c0_i32, %arg0 : i32, i32
  }
}

</mosaic_0001>

<bundles_post_ra>
// kernel: tpu_custom_call.1
= control target key start
LH: loop header
LB: loop body
LE: loop exit
PB: predicated region body
PF: predicated region fallthrough
CT: control target
= control target key end

     0   :  { %s788_s0 = inlined_call_operand.vmem [shape: f32[128,32], index: 0, kind: input, shape index: {}]   ;;  %s789_s1 = inlined_call_operand.vmem [shape: f32[64,32], index: 1, kind: input, shape index: {}]   ;;  %s790_s2 = inlined_call_operand.vmem [shape: f32[64,1], index: 2, kind: input, shape index: {}]   ;;  %s791_s3 = inlined_call_operand.vmem [shape: f32[1,64], index: 3, kind: input, shape index: {}]   ;;  %s792_s4 = inlined_call_operand.<no memory space> [shape: f32[1,1], index: 4, kind: input, shape index: {}]   ;;  %s793_s5 = inlined_call_operand.hbm [shape: f32[1,128], index: 5, kind: output, shape index: {}]  }
   0x1   :  { %v10_v0 = vstv %s792_s4 }
   0x2   :  { %11 = vst [vmem:[#allocation2] sm:$0x1] %v10_v0 }
   0x3   :  { %v31_v1 = vld [vmem:[%s788_s0] sm:$0xff]  ;;  %v32_v2 = vld [vmem:[%s788_s0 + $0x8] sm:$0xff]  ;;  %vm95_vm0 = vcmask 261120   ;;  %v33_v3 = vld [vmem:[%s788_s0 + $0x10] sm:$0xff]  ;;  %v593_v7 = vmov 0  }
   0x4   :  { %v502_v4 = vpack.c.bf16 %v32_v2, %v31_v1  ;;  %vm642_vm1 = vmpackc.low %vm95_vm0, %vm95_vm0  ;;  %v34_v6 = vld [vmem:[%s788_s0 + $0x18] sm:$0xff]  ;;  %567 = vset.pattern.permute.xlu0 %v593_v7  ;;  %568 = vset.pattern.permute.xlu1 %v593_v7  ;;  %v23_v9 = vld [vmem:[%s789_s1] sm:$0xff] }
   0x5   :  { %v508_v8 = vpack.c.bf16 %v34_v6, %v33_v3  ;;  %v35_v10 = vld [vmem:[%s788_s0 + $0x20] sm:$0xff]  ;;  %v36_v11 = vld [vmem:[%s788_s0 + $0x28] sm:$0xff]  ;;  %471 = vmatprep.mubr.msk.f32.mxu0 %vm95_vm0, %v23_v9  ;;  %v49_v14 = vld [vmem:[%s790_s2 + $0x10] sm:$0xff] }
   0x6   :  { %504 = vmatprep.subr.msk.bf16.mxu0 %vm642_vm1, %v502_v4  ;;  %v47_v12 = vld [vmem:[%s790_s2] sm:$0xff]  ;;  %v514_v13 = vpack.c.bf16 %v36_v11, %v35_v10  ;;  %v48_v15 = vld [vmem:[%s790_s2 + $0x8] sm:$0xff]  ;;  %67 = vperm.xlu1 %568, %v49_v14   ;;  %v50_v16 = vld [vmem:[%s790_s2 + $0x18] sm:$0xff] }
   0x7   :  { %507 = vmatpush3.bf16.xpose.msk.msra.mxu0 %vm642_vm1, %v502_v4  ;;  %57 = vperm.xlu0 %567, %v47_v12  }
   0x8   :  { %510 = vmatprep.subr.msk.bf16.mxu0 %vm642_vm1, %v508_v8 }
   0x9   :  { %12 = vsyncpa [#allocation4], 0  ;;  %v37_v17 = vld [vmem:[%s788_s0 + $0x30] sm:$0xff]  ;;  %v38_v18 = vld [vmem:[%s788_s0 + $0x38] sm:$0xff]  ;;  %v594_v44 = vmov 0.0|0.0   ;;  %vm595_vm2 = vmmov 0  }
   0xa   :  { %v51_v19 = vld [vmem:[%s790_s2 + $0x20] sm:$0xff]  ;;  %72 = vperm.xlu1 %568, %v50_v16   ;;  %v52_v20 = vld [vmem:[%s790_s2 + $0x28] sm:$0xff]  ;;  %v520_v21 = vpack.c.bf16 %v38_v18, %v37_v17  ;;  %v53_v22 = vld [vmem:[%s790_s2 + $0x30] sm:$0xff]  ;;  %550 = vmatprep.subr.bf16.mxu1 %v594_v44  ;;  %v596_v45 = vmov 0.0   ;;  %vm292_vm3 = vcmask 523264   ;;  %s597_s30 = smov [#allocation3]  }
   0xb   :  { %62 = vperm.xlu0 %567, %v48_v15   ;;  %v54_v23 = vld [vmem:[%s790_s2 + $0x38] sm:$0xff]  ;;  %v39_v24 = vld [vmem:[%s788_s0 + $0x40] sm:$0xff]  ;;  %v40_v25 = vld [vmem:[%s788_s0 + $0x48] sm:$0xff]  ;;  %499 = vmatprep.mubr.msk.f32.mxu1 %vm595_vm2, %v596_v45  ;;  %s373_s2 = sshll.u32 %s597_s30, 4  ;;  %s374_s2 = int_to_ptr.vmem [resolvable:$true] %s373_s2 }
   0xc   :  { %v282_v26 = vld [vmem:[#allocation2] sm:$0x1]  ;;  %v526_v27 = vpack.c.bf16 %v40_v25, %v39_v24  ;;  %v41_v28 = vld [vmem:[%s788_s0 + $0x50] sm:$0xff]  ;;  %v42_v29 = vld [vmem:[%s788_s0 + $0x58] sm:$0xff]  ;;  %s569_s6 = scalar_lea.vmem %s374_s2, 16  ;;  %s573_s7 = scalar_lea.vmem %s374_s2, 32 }
   0xd   :  { %v532_v30 = vpack.c.bf16 %v42_v29, %v41_v28  ;;  %v43_v31 = vld [vmem:[%s788_s0 + $0x60] sm:$0xff]  ;;  %v44_v32 = vld [vmem:[%s788_s0 + $0x68] sm:$0xff]  ;;  %v45_v34 = vld [vmem:[%s788_s0 + $0x70] sm:$0xff]  ;;  %p570_p0 = scmp.ne.s32.totalorder %s374_s2, %s569_s6  ;;  %p574_p1 = scmp.lt.s32.totalorder %s374_s2, %s374_s2 }
   0xe   :  { %82 = vperm.xlu1 %568, %v52_v20   ;;  %v538_v33 = vpack.c.bf16 %v44_v32, %v43_v31  ;;  %v46_v35 = vld [vmem:[%s788_s0 + $0x78] sm:$0xff]  ;;  %v24_v37 = vld [vmem:[%s789_s1 + $0x8] sm:$0xff]  ;;  %v25_v38 = vld [vmem:[%s789_s1 + $0x10] sm:$0xff]  ;;  %p575_p2 = scmp.lt.s32.totalorder %s573_s7, %s569_s6 }
   0xf   :  { %513 = vmatpush3.bf16.xpose.msk.msra.mxu0 %vm642_vm1, %v508_v8  ;;  %77 = vperm.xlu0 %567, %v51_v19   ;;  %v544_v36 = vpack.c.bf16 %v46_v35, %v45_v34  ;;  %v26_v39 = vld [vmem:[%s789_s1 + $0x18] sm:$0xff]  ;;  %v27_v40 = vld [vmem:[%s789_s1 + $0x20] sm:$0xff]  ;;  %v28_v41 = vld [vmem:[%s789_s1 + $0x28] sm:$0xff]  ;;  %v288_v19 = vlaneseq }
  0x10   :  { %516 = vmatprep.subr.msk.bf16.mxu0 %vm642_vm1, %v514_v13  ;;  %v29_v42 = vld [vmem:[%s789_s1 + $0x30] sm:$0xff]  ;;  %v30_v43 = vld [vmem:[%s789_s1 + $0x38] sm:$0xff]  ;;  %v281_v18 = vld [vmem:[%s791_s3] sm:$0x1]  ;;  %p576_p3 = por %p575_p2, %p574_p1 }
  0x11   :  { %v289_v20 = vshrl.u32 %v288_v19, 7 }
  0x12   :  { %92 = vperm.xlu1 %568, %v54_v23   ;;  %p577_p4 = pnand %p576_p3, %p570_p0 }
  0x13   :  { %87 = vperm.xlu0 %567, %v53_v22  }
  0x17   :  { %519 = vmatpush3.bf16.xpose.msk.msra.mxu0 %vm642_vm1, %v514_v13  ;;  %285 = vperm.xlu0 %567, %v282_v26  }
  0x18   :  { %522 = vmatprep.subr.msk.bf16.mxu0 %vm642_vm1, %v520_v21 }
  0x1f   :  { %525 = vmatpush3.bf16.xpose.msk.msra.mxu0 %vm642_vm1, %v520_v21  ;;  %v290_v21 = vsub.s32 0, %v289_v20 }
  0x20   :  { %528 = vmatprep.subr.msk.bf16.mxu0 %vm642_vm1, %v526_v27 }
  0x27   :  { %531 = vmatpush3.bf16.xpose.msk.msra.mxu0 %vm642_vm1, %v526_v27 }
  0x28   :  { %534 = vmatprep.subr.msk.bf16.mxu0 %vm642_vm1, %v532_v30 }
  0x2f   :  { %537 = vmatpush3.bf16.xpose.msk.msra.mxu0 %vm642_vm1, %v532_v30 }
  0x30   :  { %540 = vmatprep.subr.msk.bf16.mxu0 %vm642_vm1, %v538_v33 }
  0x37   :  { %543 = vmatpush3.bf16.xpose.msk.msra.mxu0 %vm642_vm1, %v538_v33 }
  0x38   :  { %546 = vmatprep.subr.msk.bf16.mxu0 %vm642_vm1, %v544_v36 }
  0x3f   :  { %549 = vmatpush3.bf16.xpose.msk.msra.mxu0 %vm642_vm1, %v544_v36 }
  0x46   :  { %472 = vmatmul.mubr.msk.f32.vlgmr.msra.gmra.mrb[0].mxu0 %vm95_vm0, %v24_v37 }
  0x47   :  { %474 = vmatprep.mubr.msk.f32.mxu0 %vm95_vm0, %v25_v38 }
  0x4a   :  { %475 = vmatmul.mubr.msk.f32.gmra.mrb[2].mxu0 %vm95_vm0, %v26_v39 }
  0x4b   :  { %477 = vmatprep.mubr.msk.f32.mxu0 %vm95_vm0, %v27_v40 }
  0x4e   :  { %478 = vmatmul.mubr.msk.f32.gmra.mrb[4].mxu0 %vm95_vm0, %v28_v41 }
  0x4f   :  { %480 = vmatprep.mubr.msk.f32.mxu0 %vm95_vm0, %v29_v42 }
  0x52   :  { %481 = vmatmul.mubr.msk.f32.gmra.mrb[6].mxu0 %vm95_vm0, %v30_v43 }
  0x85   :  { %v68_v47 = vpop.permute.xlu1 %67 }
  0x86   :  { %v58_v46 = vpop.permute.xlu0 %57 }
  0x89   :  { %v73_v49 = vpop.permute.xlu1 %72 }
  0x8a   :  { %v63_v48 = vpop.permute.xlu0 %62 }
  0x8d   :  { %v83_v59 = vpop.permute.xlu1 %82 }
  0x8e   :  { %v78_v62 = vpop.permute.xlu0 %77 }
  0x91   :  { %v93_v7 = vpop.permute.xlu1 %92 }
  0x92   :  { %v88_v10 = vpop.permute.xlu0 %87 }
  0x96   :  { %v286_v22 = vpop.permute.xlu0 %285 }
  0x97   :  { %v291_v23 = vrot.slane %v286_v22, %v290_v21 }
 0x119   :  { %v473_v50 = vpop.f32.mrb[0].mxu0 }
 0x11a   :  { %v240_v51 = vadd.f32 %v473_v50, %v63_v48  ;;  %v234_v52 = vpop.f32.mrb[1].mxu0 }
 0x11b   :  { %v235_v53 = vadd.f32 %v234_v52, %v58_v46 }
 0x11c   :  { %v274_v54 = vmax.f32 %v240_v51, 0.0 }
 0x11d   :  { %v273_v55 = vmax.f32 %v235_v53, 0.0  ;;  %v476_v56 = vpop.f32.mrb[2].mxu0 }
 0x11e   :  { %v250_v57 = vadd.f32 %v476_v56, %v73_v49  ;;  %v244_v58 = vpop.f32.mrb[3].mxu0 }
 0x11f   :  { %v245_v60 = vadd.f32 %v244_v58, %v68_v47  ;;  %v551_v61 = vpack.c.bf16 %v274_v54, %v273_v55 }
 0x120   :  { %v276_v63 = vmax.f32 %v250_v57, 0.0 }
 0x121   :  { %v275_v0 = vmax.f32 %v245_v60, 0.0  ;;  %v479_v1 = vpop.f32.mrb[4].mxu0  ;;  %552 = vmatpush3.bf16.msra.mxu1 %v551_v61 }
 0x122   :  { %v260_v2 = vadd.f32 %v479_v1, %v83_v59  ;;  %v254_v3 = vpop.f32.mrb[5].mxu0  ;;  %553 = vmatprep.subr.bf16.mxu1 %v594_v44 }
 0x123   :  { %v554_v4 = vpack.c.bf16 %v276_v63, %v275_v0  ;;  %v255_v5 = vadd.f32 %v254_v3, %v78_v62 }
 0x124   :  { %v278_v6 = vmax.f32 %v260_v2, 0.0 }
 0x125   :  { %v277_v8 = vmax.f32 %v255_v5, 0.0  ;;  %v482_v9 = vpop.f32.mrb[6].mxu0  ;;  %555 = vmatpush3.bf16.msra.mxu1 %v554_v4 }
 0x126   :  { %v270_v11 = vadd.f32 %v482_v9, %v93_v7  ;;  %v264_v12 = vpop.f32.mrb[7].mxu0  ;;  %556 = vmatprep.subr.bf16.mxu1 %v594_v44 }
 0x127   :  { %v557_v13 = vpack.c.bf16 %v278_v6, %v277_v8  ;;  %v265_v14 = vadd.f32 %v264_v12, %v88_v10 }
 0x128   :  { %v280_v15 = vmax.f32 %v270_v11, 0.0 }
 0x129   :  { %v279_v16 = vmax.f32 %v265_v14, 0.0  ;;  %558 = vmatpush3.bf16.msra.mxu1 %v557_v13 }
 0x12a   :  { %559 = vmatprep.subr.bf16.mxu1 %v594_v44 }
 0x12b   :  { %v560_v17 = vpack.c.bf16 %v280_v15, %v279_v16 }
 0x12d   :  { %561 = vmatpush3.bf16.msra.mxu1 %v560_v17 }
 0x130   :  { %500 = vmatmul.mubr.msk.f32.vlgmr.msra.gmra.mrb[0].mxu1 %vm292_vm3, %v281_v18 }
 0x203   :  { %v362_v24 = vpop.f32.mrb[0].mxu1 }
 0x204   :  { %v363_v25 = vadd.f32 %v362_v24, %v291_v23  ;;  %v501_v26 = vpop.f32.mrb[1].mxu1 }
 0x206   :  { %366 = vst [vmem:[#allocation3] sm:$0x1] %v363_v25 }
 0x207   :  { %580 = shalt.err (!%p577_p4)
}
 0x208   :  { %s581_s9 = scalar_lea.hbm %s793_s5, 16 }
 0x209   :  { %p582_p5 = scmp.ne.s32.totalorder %s793_s5, %s581_s9  ;;  %p585_p6 = scmp.lt.u32.totalorder %s581_s9, %s793_s5 }
 0x20b   :  { %p587_p7 = pnand %p585_p6, %p582_p5 }
 0x20d   :  { %590 = shalt.err (!%p587_p7)
}
 0x20e   :  { %376 = dma.vmem_to_hbm [thread:$0]  %s374_s2, 16, %s793_s5, [#allocation4]  }
 0x20f   :  { %591 = dma.done.wait [#allocation4], 16  }
 0x210   :  { %592 = vsyncadd [#allocation4], 4294967280 }
 0x211   :  { %380 = vsyncpa [#allocation4], 1 }

</bundles_post_ra>
